<compile_context>
chip_gen: v5e
topology: v5e:2x2
jax: 0.10.0
libtpu: 0.0.40
codegen_flags: <defaults>
</compile_context>

<pallas_src>
import functools

import jax
import jax.numpy as jnp
from jax import lax
from jax.experimental import pallas as pl
from jax.experimental.pallas import tpu as pltpu


def _conv_block(x, w, mask, *, k, p, H, W):
    """k*k-tap depthwise conv of one (1, c_tile, H*W) block, f32 accumulate.

    Layout: channels on sublanes, flattened H*W on the lane axis.  A 128-lane-
    aligned zero apron on each side of the flattened row handles the H
    boundary; per-dx lane masks handle the W boundary wrap.  No padded copy of
    x ever exists in HBM.
    """
    HW = H * W
    c_t = x.shape[1]
    pad = p * W + p
    apron = ((pad + 127) // 128) * 128           # aligned concat boundaries
    z = jnp.zeros((1, c_t, apron), jnp.float32)
    xpad = jnp.concatenate([z, x, z], axis=2)    # (1, c_t, HW + 2*apron), VMEM-local
    base = apron - pad

    acc = jnp.zeros((1, c_t, HW), jnp.float32)
    for dx in range(k):                          # W-boundary mask hoisted per dx
        part = jnp.zeros((1, c_t, HW), jnp.float32)
        for dy in range(k):
            tap = dy * k + dx
            off = base + dy * W + dx             # static lane-slice offset
            # per-channel tap weight (c_t, 1) broadcast across the lane axis
            part = part + xpad[:, :, off:off + HW] * w[:, tap:tap + 1]
        acc = acc + (part if dx == p else part * mask[dx:dx + 1])
    return acc


def _dw_stats_kernel(x_ref, w_ref, mask_ref, sum_ref, sq_ref, *, k, p, H, W):
    """Pass 1: per-(image, channel-tile) conv-output sum / sum-of-squares only."""
    y = _conv_block(x_ref[...].astype(jnp.float32), w_ref[...], mask_ref[...],
                    k=k, p=p, H=H, W=W)
    sum_ref[...] = jnp.sum(y, axis=2, keepdims=True)
    sq_ref[...] = jnp.sum(y * y, axis=2, keepdims=True)


def _dw_conv_bn_kernel(x_ref, w_ref, shift_ref, mask_ref, o_ref, *, k, p, H, W):
    """Pass 2: recomputed conv (BN scale folded into taps) + shift, one store."""
    y = _conv_block(x_ref[...].astype(jnp.float32), w_ref[...], mask_ref[...],
                    k=k, p=p, H=H, W=W)
    o_ref[...] = (y + shift_ref[...]).astype(o_ref.dtype)


def _pick_c_tile(C, HW, max_block_bytes):
    """Largest channel tile (C itself, or a multiple of 8 dividing C) whose
    (1, c_tile, HW) f32 block stays under max_block_bytes."""
    max_c = max(1, max_block_bytes // (HW * 4))
    if C <= max_c:
        return C
    best = 8 if C % 8 == 0 else C
    d = 8
    while d <= min(C, max_c):
        if C % d == 0:
            best = d
        d += 8
    return best


def depthwise_conv_bn(x_nchw, w_oikk, conv_bias, bn_gamma, bn_beta, *, eps=1e-5):
    """Forward of DepthwiseConvBN (depthwise Conv2d + training-mode BatchNorm2d)."""
    del conv_bias  # cancels exactly: BN subtracts the per-channel batch mean
    N, C, H, W = x_nchw.shape
    k = w_oikk.shape[-1]
    assert k % 2 == 1, "odd kernel size assumed for 'same' padding"
    p = k // 2
    HW = H * W

    # NCHW kept as-is; only free contiguous reshapes on image-sized data.
    x_flat = x_nchw.reshape(N, C, HW)
    w_taps = w_oikk.reshape(C, k * k).astype(jnp.float32)       # (C, k*k)

    # Per-dx 0/1 lane masks for the W boundary (tiny, VMEM resident).
    wcoord = jnp.arange(HW, dtype=jnp.int32) % W
    mask = jnp.stack(
        [((wcoord + (dx - p) >= 0) & (wcoord + (dx - p) < W)).astype(jnp.float32)
         for dx in range(k)], axis=0)                           # (k, HW)

    # Chip-aware VMEM budget: ~half of physical (128 MiB v5e/v6e, 64 MiB v7x).
    try:
        vmem_phys = int(pltpu.get_tpu_info().vmem_capacity_bytes)
    except Exception:  # pragma: no cover - conservative fallback
        vmem_phys = 64 * 1024 * 1024
    vmem_cap = min(vmem_phys // 2, 96 * 1024 * 1024)
    c_tile = _pick_c_tile(C, HW, vmem_cap // 12)   # in/out double-buffered + temps
    grid = (N, C // c_tile)

    x_spec = pl.BlockSpec((1, c_tile, HW), lambda n, c: (n, c, 0))
    w_spec = pl.BlockSpec((c_tile, k * k), lambda n, c: (c, 0))   # per c-tile, resident over n
    m_spec = pl.BlockSpec((k, HW), lambda n, c: (0, 0))           # resident
    s_spec = pl.BlockSpec((1, c_tile, 1), lambda n, c: (n, c, 0))
    cparams = pltpu.CompilerParams(
        dimension_semantics=("parallel", "parallel"),   # independent tiles (v7x 2 TCs)
        vmem_limit_bytes=vmem_cap)

    # ---- pass 1: stats only (no conv output written to HBM) ----------------
    sum_nc, sq_nc = pl.pallas_call(
        functools.partial(_dw_stats_kernel, k=k, p=p, H=H, W=W),
        out_shape=(jax.ShapeDtypeStruct((N, C, 1), jnp.float32),
                   jax.ShapeDtypeStruct((N, C, 1), jnp.float32)),
        grid=grid,
        in_specs=[x_spec, w_spec, m_spec],
        out_specs=(s_spec, s_spec),
        compiler_params=cparams,
    )(x_flat, w_taps, mask)

    # ---- fold batch stats into per-channel scale/shift ----------------------
    count = float(N * H * W)
    mean = jnp.sum(sum_nc[:, :, 0], axis=0) / count
    var = jnp.maximum(jnp.sum(sq_nc[:, :, 0], axis=0) / count - mean * mean, 0.0)
    scale = bn_gamma.astype(jnp.float32) * lax.rsqrt(var + eps)          # (C,)
    shift = (bn_beta.astype(jnp.float32) - mean * scale).reshape(C, 1)   # (C, 1)
    w_scaled = w_taps * scale[:, None]          # fold BN scale into conv taps

    # ---- pass 2: fused conv (recomputed) + BN affine, single HBM write -----
    out_flat = pl.pallas_call(
        functools.partial(_dw_conv_bn_kernel, k=k, p=p, H=H, W=W),
        out_shape=jax.ShapeDtypeStruct((N, C, HW), x_nchw.dtype),
        grid=grid,
        in_specs=[x_spec, w_spec,
                  pl.BlockSpec((c_tile, 1), lambda n, c: (c, 0)),
                  m_spec],
        out_specs=x_spec,
        compiler_params=cparams,
    )(x_flat, w_scaled, shift, mask)

    return out_flat.reshape(N, C, H, W)


def _reference(x_nchw, w_oikk, conv_bias, bn_gamma, bn_beta, eps=1e-5):
    """Pure-JAX reference mirroring the PyTorch forward (training-mode BN).

    Includes the conv bias (which must cancel in the Pallas output)."""
    N, C, H, W = x_nchw.shape
    y = lax.conv_general_dilated(
        x_nchw.astype(jnp.float32), w_oikk.astype(jnp.float32),
        window_strides=(1, 1), padding="SAME",
        dimension_numbers=("NCHW", "OIHW", "NCHW"), feature_group_count=C)
    y = y + conv_bias.reshape(1, C, 1, 1)
    mean = jnp.mean(y, axis=(0, 2, 3), keepdims=True)
    var = jnp.mean((y - mean) ** 2, axis=(0, 2, 3), keepdims=True)
    return (y - mean) * lax.rsqrt(var + eps) * bn_gamma.reshape(1, C, 1, 1) \
        + bn_beta.reshape(1, C, 1, 1)


if __name__ == "__main__":
    key = jax.random.PRNGKey(0)
    N, C, H, W, k = 2, 4, 16, 16, 3

    k_x, k_w, k_b = jax.random.split(key, 3)
    x = jax.random.normal(k_x, (N, C, H, W), dtype=jnp.float32)
    # Depthwise Conv2d(C, C, k, groups=C): weight (C, 1, k, k), bias (C,)
    w = jax.random.normal(k_w, (C, 1, k, k), dtype=jnp.float32) * 0.2
    conv_bias = jax.random.normal(k_b, (C,), dtype=jnp.float32) * 0.1
    # BatchNorm2d init: weight = 1, bias = 0
    bn_gamma = jnp.ones((C,), dtype=jnp.float32)
    bn_beta = jnp.zeros((C,), dtype=jnp.float32)
    # TODO(synk): BN running_mean/running_var buffer updates (training side
    # effect) are not materialized; they do not affect the forward output.

    out = depthwise_conv_bn(x, w, conv_bias, bn_gamma, bn_beta)
    out = jax.block_until_ready(out)

    ref = _reference(x, w, conv_bias, bn_gamma, bn_beta)
    assert out.shape == (N, C, H, W)
    err = jnp.max(jnp.abs(out - ref))
    assert jnp.allclose(out, ref, rtol=1e-4, atol=1e-4), f"max abs err {err}"

    print("KERNEL_OK")
</pallas_src>

<mosaic_0001>
module attributes {stable_mosaic.version = 11 : i64} {
  func.func @_dw_stats_kernel(%arg0: i32, %arg1: i32, %arg2: memref<1x4x256xf32, #tpu.memory_space<vmem>>, %arg3: memref<4x9xf32, #tpu.memory_space<vmem>>, %arg4: memref<3x256xf32, #tpu.memory_space<vmem>>, %arg5: memref<1x4x1xf32, #tpu.memory_space<vmem>>, %arg6: memref<1x4x1xf32, #tpu.memory_space<vmem>>) attributes {dimension_semantics = [#tpu.dimension_semantics<parallel>, #tpu.dimension_semantics<parallel>], iteration_bounds = array<i64: 2, 1>, scalar_prefetch = 0 : i64, scratch_operands = 0 : i64, tpu.core_type = #tpu.core_type<tc>, window_params = [{transform_indices = @transform_0, window_bounds = array<i64: 1, 4, 256>}, {transform_indices = @transform_1, window_bounds = array<i64: 4, 9>}, {pipeline_mode = #tpu.pipeline_mode<synchronous>, transform_indices = @transform_2, window_bounds = array<i64: 3, 256>}, {transform_indices = @transform_3, window_bounds = array<i64: 1, 4, 1>}, {transform_indices = @transform_4, window_bounds = array<i64: 1, 4, 1>}]} {
    %c0 = arith.constant 0 : index
    %c0_0 = arith.constant 0 : index
    %c0_1 = arith.constant 0 : index
    %0 = vector.load %arg2[%c0, %c0_0, %c0_1] : memref<1x4x256xf32, #tpu.memory_space<vmem>>, vector<1x4x256xf32>
    %c0_2 = arith.constant 0 : index
    %c0_3 = arith.constant 0 : index
    %1 = vector.load %arg3[%c0_2, %c0_3] : memref<4x9xf32, #tpu.memory_space<vmem>>, vector<4x9xf32>
    %c0_4 = arith.constant 0 : index
    %c0_5 = arith.constant 0 : index
    %2 = vector.load %arg4[%c0_4, %c0_5] : memref<3x256xf32, #tpu.memory_space<vmem>>, vector<3x256xf32>
    %cst = arith.constant 0.000000e+00 : f32
    %3 = vector.broadcast %cst : f32 to vector<1x4x128xf32>
    %4 = tpu.concatenate %3, %0, %3 in 2 : vector<1x4x128xf32>, vector<1x4x256xf32>, vector<1x4x128xf32> -> vector<1x4x512xf32>
    %cst_6 = arith.constant 0.000000e+00 : f32
    %5 = vector.broadcast %cst_6 : f32 to vector<1x4x256xf32>
    %cst_7 = arith.constant 0.000000e+00 : f32
    %6 = vector.broadcast %cst_7 : f32 to vector<1x4x256xf32>
    %7 = vector.extract_strided_slice %4 {offsets = [0, 0, 111], sizes = [1, 4, 256], strides = [1, 1, 1]} : vector<1x4x512xf32> to vector<1x4x256xf32>
    %8 = vector.extract_strided_slice %1 {offsets = [0, 0], sizes = [4, 1], strides = [1, 1]} : vector<4x9xf32> to vector<4x1xf32>
    %9 = vector.shape_cast %8 : vector<4x1xf32> to vector<1x4x1xf32>
    %10 = vector.broadcast %9 : vector<1x4x1xf32> to vector<1x4x256xf32>
    %11 = arith.mulf %7, %10 : vector<1x4x256xf32>
    %12 = arith.addf %6, %11 : vector<1x4x256xf32>
    %13 = vector.extract_strided_slice %4 {offsets = [0, 0, 127], sizes = [1, 4, 256], strides = [1, 1, 1]} : vector<1x4x512xf32> to vector<1x4x256xf32>
    %14 = vector.extract_strided_slice %1 {offsets = [0, 3], sizes = [4, 1], strides = [1, 1]} : vector<4x9xf32> to vector<4x1xf32>
    %15 = vector.shape_cast %14 : vector<4x1xf32> to vector<1x4x1xf32>
    %16 = vector.broadcast %15 : vector<1x4x1xf32> to vector<1x4x256xf32>
    %17 = arith.mulf %13, %16 : vector<1x4x256xf32>
    %18 = arith.addf %12, %17 : vector<1x4x256xf32>
    %19 = vector.extract_strided_slice %4 {offsets = [0, 0, 143], sizes = [1, 4, 256], strides = [1, 1, 1]} : vector<1x4x512xf32> to vector<1x4x256xf32>
    %20 = vector.extract_strided_slice %1 {offsets = [0, 6], sizes = [4, 1], strides = [1, 1]} : vector<4x9xf32> to vector<4x1xf32>
    %21 = vector.shape_cast %20 : vector<4x1xf32> to vector<1x4x1xf32>
    %22 = vector.broadcast %21 : vector<1x4x1xf32> to vector<1x4x256xf32>
    %23 = arith.mulf %19, %22 : vector<1x4x256xf32>
    %24 = arith.addf %18, %23 : vector<1x4x256xf32>
    %25 = vector.extract_strided_slice %2 {offsets = [0, 0], sizes = [1, 256], strides = [1, 1]} : vector<3x256xf32> to vector<1x256xf32>
    %26 = vector.shape_cast %25 : vector<1x256xf32> to vector<1x1x256xf32>
    %27 = vector.broadcast %26 : vector<1x1x256xf32> to vector<1x4x256xf32>
    %28 = arith.mulf %24, %27 : vector<1x4x256xf32>
    %29 = arith.addf %5, %28 : vector<1x4x256xf32>
    %cst_8 = arith.constant 0.000000e+00 : f32
    %30 = vector.broadcast %cst_8 : f32 to vector<1x4x256xf32>
    %31 = vector.extract_strided_slice %4 {offsets = [0, 0, 112], sizes = [1, 4, 256], strides = [1, 1, 1]} : vector<1x4x512xf32> to vector<1x4x256xf32>
    %32 = vector.extract_strided_slice %1 {offsets = [0, 1], sizes = [4, 1], strides = [1, 1]} : vector<4x9xf32> to vector<4x1xf32>
    %33 = vector.shape_cast %32 : vector<4x1xf32> to vector<1x4x1xf32>
    %34 = vector.broadcast %33 : vector<1x4x1xf32> to vector<1x4x256xf32>
    %35 = arith.mulf %31, %34 : vector<1x4x256xf32>
    %36 = arith.addf %30, %35 : vector<1x4x256xf32>
    %37 = vector.extract_strided_slice %4 {offsets = [0, 0, 128], sizes = [1, 4, 256], strides = [1, 1, 1]} : vector<1x4x512xf32> to vector<1x4x256xf32>
    %38 = vector.extract_strided_slice %1 {offsets = [0, 4], sizes = [4, 1], strides = [1, 1]} : vector<4x9xf32> to vector<4x1xf32>
    %39 = vector.shape_cast %38 : vector<4x1xf32> to vector<1x4x1xf32>
    %40 = vector.broadcast %39 : vector<1x4x1xf32> to vector<1x4x256xf32>
    %41 = arith.mulf %37, %40 : vector<1x4x256xf32>
    %42 = arith.addf %36, %41 : vector<1x4x256xf32>
    %43 = vector.extract_strided_slice %4 {offsets = [0, 0, 144], sizes = [1, 4, 256], strides = [1, 1, 1]} : vector<1x4x512xf32> to vector<1x4x256xf32>
    %44 = vector.extract_strided_slice %1 {offsets = [0, 7], sizes = [4, 1], strides = [1, 1]} : vector<4x9xf32> to vector<4x1xf32>
    %45 = vector.shape_cast %44 : vector<4x1xf32> to vector<1x4x1xf32>
    %46 = vector.broadcast %45 : vector<1x4x1xf32> to vector<1x4x256xf32>
    %47 = arith.mulf %43, %46 : vector<1x4x256xf32>
    %48 = arith.addf %42, %47 : vector<1x4x256xf32>
    %49 = arith.addf %29, %48 : vector<1x4x256xf32>
    %cst_9 = arith.constant 0.000000e+00 : f32
    %50 = vector.broadcast %cst_9 : f32 to vector<1x4x256xf32>
    %51 = vector.extract_strided_slice %4 {offsets = [0, 0, 113], sizes = [1, 4, 256], strides = [1, 1, 1]} : vector<1x4x512xf32> to vector<1x4x256xf32>
    %52 = vector.extract_strided_slice %1 {offsets = [0, 2], sizes = [4, 1], strides = [1, 1]} : vector<4x9xf32> to vector<4x1xf32>
    %53 = vector.shape_cast %52 : vector<4x1xf32> to vector<1x4x1xf32>
    %54 = vector.broadcast %53 : vector<1x4x1xf32> to vector<1x4x256xf32>
    %55 = arith.mulf %51, %54 : vector<1x4x256xf32>
    %56 = arith.addf %50, %55 : vector<1x4x256xf32>
    %57 = vector.extract_strided_slice %4 {offsets = [0, 0, 129], sizes = [1, 4, 256], strides = [1, 1, 1]} : vector<1x4x512xf32> to vector<1x4x256xf32>
    %58 = vector.extract_strided_slice %1 {offsets = [0, 5], sizes = [4, 1], strides = [1, 1]} : vector<4x9xf32> to vector<4x1xf32>
    %59 = vector.shape_cast %58 : vector<4x1xf32> to vector<1x4x1xf32>
    %60 = vector.broadcast %59 : vector<1x4x1xf32> to vector<1x4x256xf32>
    %61 = arith.mulf %57, %60 : vector<1x4x256xf32>
    %62 = arith.addf %56, %61 : vector<1x4x256xf32>
    %63 = vector.extract_strided_slice %4 {offsets = [0, 0, 145], sizes = [1, 4, 256], strides = [1, 1, 1]} : vector<1x4x512xf32> to vector<1x4x256xf32>
    %64 = vector.extract_strided_slice %1 {offsets = [0, 8], sizes = [4, 1], strides = [1, 1]} : vector<4x9xf32> to vector<4x1xf32>
    %65 = vector.shape_cast %64 : vector<4x1xf32> to vector<1x4x1xf32>
    %66 = vector.broadcast %65 : vector<1x4x1xf32> to vector<1x4x256xf32>
    %67 = arith.mulf %63, %66 : vector<1x4x256xf32>
    %68 = arith.addf %62, %67 : vector<1x4x256xf32>
    %69 = vector.extract_strided_slice %2 {offsets = [2, 0], sizes = [1, 256], strides = [1, 1]} : vector<3x256xf32> to vector<1x256xf32>
    %70 = vector.shape_cast %69 : vector<1x256xf32> to vector<1x1x256xf32>
    %71 = vector.broadcast %70 : vector<1x1x256xf32> to vector<1x4x256xf32>
    %72 = arith.mulf %68, %71 : vector<1x4x256xf32>
    %73 = arith.addf %49, %72 : vector<1x4x256xf32>
    %cst_10 = arith.constant dense<0.000000e+00> : vector<1x4xf32>
    %74 = vector.multi_reduction <add>, %73, %cst_10 [2] : vector<1x4x256xf32> to vector<1x4xf32>
    %75 = vector.shape_cast %74 : vector<1x4xf32> to vector<1x4x1xf32>
    %c0_11 = arith.constant 0 : index
    %c0_12 = arith.constant 0 : index
    %c0_13 = arith.constant 0 : index
    %76 = vector.load %arg5[%c0_11, %c0_12, %c0_13] : memref<1x4x1xf32, #tpu.memory_space<vmem>>, vector<1x4x1xf32>
    tpu.vector_store %arg5[%c0_11, %c0_12, %c0_13], %75 {strides = array<i32>} : memref<1x4x1xf32, #tpu.memory_space<vmem>>, vector<1x4x1xf32>,
    %77 = arith.mulf %73, %73 : vector<1x4x256xf32>
    %cst_14 = arith.constant dense<0.000000e+00> : vector<1x4xf32>
    %78 = vector.multi_reduction <add>, %77, %cst_14 [2] : vector<1x4x256xf32> to vector<1x4xf32>
    %79 = vector.shape_cast %78 : vector<1x4xf32> to vector<1x4x1xf32>
    %c0_15 = arith.constant 0 : index
    %c0_16 = arith.constant 0 : index
    %c0_17 = arith.constant 0 : index
    %80 = vector.load %arg6[%c0_15, %c0_16, %c0_17] : memref<1x4x1xf32, #tpu.memory_space<vmem>>, vector<1x4x1xf32>
    tpu.vector_store %arg6[%c0_15, %c0_16, %c0_17], %79 {strides = array<i32>} : memref<1x4x1xf32, #tpu.memory_space<vmem>>, vector<1x4x1xf32>,
    return
  }
  func.func @transform_0(%arg0: i32, %arg1: i32) -> (i32, i32, i32) {
    %c0_i32 = arith.constant 0 : i32
    %c0_i32_0 = arith.constant 0 : i32
    return %arg0, %arg1, %c0_i32 : i32, i32, i32
  }
  func.func @transform_1(%arg0: i32, %arg1: i32) -> (i32, i32) {
    %c0_i32 = arith.constant 0 : i32
    %c0_i32_0 = arith.constant 0 : i32
    return %arg1, %c0_i32 : i32, i32
  }
  func.func @transform_2(%arg0: i32, %arg1: i32) -> (i32, i32) {
    %c0_i32 = arith.constant 0 : i32
    %c0_i32_0 = arith.constant 0 : i32
    %c0_i32_1 = arith.constant 0 : i32
    return %c0_i32, %c0_i32_0 : i32, i32
  }
  func.func @transform_3(%arg0: i32, %arg1: i32) -> (i32, i32, i32) {
    %c0_i32 = arith.constant 0 : i32
    %c0_i32_0 = arith.constant 0 : i32
    return %arg0, %arg1, %c0_i32 : i32, i32, i32
  }
  func.func @transform_4(%arg0: i32, %arg1: i32) -> (i32, i32, i32) {
    %c0_i32 = arith.constant 0 : i32
    %c0_i32_0 = arith.constant 0 : i32
    return %arg0, %arg1, %c0_i32 : i32, i32, i32
  }
}

</mosaic_0001>

<bundles_post_ra>
// kernel: tpu_custom_call.1
= control target key start
LH: loop header
LB: loop body
LE: loop exit
PB: predicated region body
PF: predicated region fallthrough
CT: control target
= control target key end

     0   :  { %10 = vsyncpa [#allocation3], 0  ;;  %s1233_s0 = inlined_call_operand.hbm [shape: f32[2,4,256], index: 0, kind: input, shape index: {}]   ;;  %s1234_s1 = inlined_call_operand.hbm [shape: f32[4,9], index: 1, kind: input, shape index: {}]   ;;  %s1235_s2 = inlined_call_operand.hbm [shape: f32[3,256], index: 2, kind: input, shape index: {}]   ;;  %s1236_s3 = inlined_call_operand.vmem [shape: f32[2,4,1], index: 3, kind: output, shape index: {0}]   ;;  %s1237_s4 = inlined_call_operand.vmem [shape: f32[2,4,1], index: 4, kind: output, shape index: {1}]  }
   0x1   :  { %12 = vsyncpa [#allocation3 + $0x1], 0 }
   0x2   :  { %13 = vsyncpa [#allocation5], 0  ;;  %s1057_s15 = smov 0   ;;  %s1059_s16 = smov 0  }
   0x3   :  { %s1061_s17 = smov 0   ;;  %s1063_s18 = smov 0  }
   0x4   :  { %s1065_s19 = smov 0   ;;  %s1067_s20 = smov 0  }
   0x5 LB: > { %s748_s21 = sadd.s32 4294967295, %s1012_s20   ;;  %p53_p0 = scmp.ne.s32.totalorder %s996_s16, %s992_s15  ;;  %s1012_s20 = sphi %s1067_s20, %s19_s20   ;;  %s1008_s19 = sphi %s1065_s19, %s1246_s19   ;;  %s1004_s18 = sphi %s1063_s18, %s1245_s18   ;;  %s1000_s17 = sphi %s1061_s17, %s1244_s17   ;;  %s996_s16 = sphi %s1059_s16, %s1243_s16   ;;  %s992_s15 = sphi %s1057_s15, %s1242_s15  }
   0x6   : > { %p1087_p1 = scmp.eq.s32.totalorder %s748_s21, 0  ;;  %p750_p2 = scmp.ge.s32.totalorder %s1012_s20, 1 }
   0x7   : > { %p167_p3 = scmp.lt.s32.totalorder %s1012_s20, 3  ;;  %s181_s26 = sshll.u32 %s1234_s1, 4  ;;  %s182_s26 = int_to_ptr.hbm [resolvable:$true] %s181_s26 }
   0x8   : > { %p1095_p4 = por %p1087_p1, %p53_p0  ;;  %s1014_s28 = smov [#allocation4]  }
   0x9   : > { %p1102_p5 = pnand %p750_p2, %p167_p3  ;;  %s183_s29 = sshll.u32 %s1014_s28, 4  ;;  %s184_s29 = int_to_ptr.vmem [resolvable:$true] %s183_s29 }
   0xa   : > { %s193_s6 = sshll.u32 %s1235_s2, 4  ;;  %s1015_s7 = smov [#allocation6]   ;;  %s194_s6 = int_to_ptr.hbm [resolvable:$true] %s193_s6 }
   0xb   : > { %p776_p6 = pneg %p1102_p5  ;;  %s195_s8 = sshll.u32 %s1015_s7, 4  ;;  %s196_s8 = int_to_ptr.vmem [resolvable:$true] %s195_s8 }
   0xc   : > { %s31_s9 = sadd.s32 1, %s1008_s19  ;;  %s40_s10 = sadd.s32 1, %s1000_s17 }
   0xd   : > { %p777_p7 = pnand %p776_p6, %p1087_p1  ;;  %p33_p8 = scmp.ge.s32.totalorder %s31_s9, 2 }
   0xe   : > { %p47_p9 = scmp.ne.s32.totalorder %s1000_s17, %s996_s16  ;;  %p48_p10 = scmp.eq.s32.totalorder %s1012_s20, 0 }
   0xf   : > { %779 = dma.hbm_to_vmem [thread:$0]  (!%p777_p7), %s182_s26, 64, %s184_s29, [#allocation5]  }
  0x10   : > { %782 = dma.hbm_to_vmem [thread:$0]  (!%p777_p7), %s194_s6, 128, %s196_s8, [#allocation5]  }
  0x11   : > { %p789_p11 = scmp.lt.s32.totalorder %s1012_s20, 2  ;;  %s1248_s9 = smov (%p33_p8, %s31_s9), 0 }
  0x12   : > { %p1121_p12 = por %p48_p10, %p47_p9  ;;  %s206_s12 = sand.u32 1, %s1000_s17  }
  0x13   : > { %s35_s13 = ssub.s32 %s1008_s19, %s1248_s9  ;;  %s754_s14 = sshll.u32 %s206_s12, 3 }
  0x14   : > { %p38_p13 = scmp.eq.s32.totalorder %s35_s13, 0  ;;  %s765_s15 = sshll.u32 %s1008_s19, 3 }
  0x15   : > { %s217_s26 = scalar_lea.hbm %s1233_s0, %s765_s15  ;;  %s210_s28 = scalar_lea.vmem [#allocation2], %s754_s14 }
  0x16   : > { %s1130_s21 = scalar_select %p38_p13, %s1000_s17, %s40_s10  }
  0x17   : > { %s221_s29 = sshll.u32 %s210_s28, 4  ;;  %s219_s30 = sshll.u32 %s217_s26, 4  ;;  %s222_s29 = int_to_ptr.vmem [resolvable:$true] %s221_s29  ;;  %s220_s30 = int_to_ptr.hbm [resolvable:$true] %s219_s30 }
  0x18   : > { %p784_p0 = pnand %p789_p11, %p1121_p12  ;;  %s207_s5 = scalar_lea.sflag [#allocation3], %s206_s12 }
  0x19   : > { %230 = sbr.rel (%p1102_p5) target bundleno = 664 (0x298), region = 32  ;;  %s232_s6 = sand.u32 (!%p1102_p5), 1, %s996_s16  }
  0x1a   : > { %786 = dma.hbm_to_vmem [thread:$0]  (!%p784_p0), %s220_s30, 128, %s222_s29, %s207_s5  }
  0x1b   : > { %s758_s7 = sshll.u32 (!%p1102_p5), %s232_s6, 3  ;;  %s233_s8 = scalar_lea.sflag (!%p1102_p5), [#allocation3], %s232_s6 }
  0x1c   : > { %s236_s10 = scalar_lea.vmem (!%p1102_p5), [#allocation2], %s758_s7 }
  0x1e   : > { %983 = dma.done.wait (%p1095_p4), %s233_s8, 128  }
  0x1f   : > { %985 = vsyncadd (%p1095_p4), %s233_s8, 4294967168 }
  0x20   : > { %987 = dma.done.wait (%p1087_p1), [#allocation5], 192  }
  0x21   : > { %989 = vsyncadd (%p1087_p1), [#allocation5], 4294967104  ;;  %v1016_v0 = vmov 4   ;;  %v1017_v1 = vmov 7   ;;  %v1018_v2 = vmov 3   ;;  %v295_v3 = vld [vmem:[%s236_s10] sm:$0xff] }
  0x22   : > { %858 = vset.pattern.permute.xlu0 %v1016_v0  ;;  %860 = vset.pattern.permute.xlu1 %v1017_v1  ;;  %v296_v4 = vld [vmem:[#allocation4] sm:$0xf]  ;;  %299 = vst [vmem:[#allocation1] ss:$2 sm:$0xff] %v295_v3  ;;  %v1019_v5 = vmov 5   ;;  %v1020_v6 = vmov 8  }
  0x23   : > { %862 = vset.pattern.permute.xlu2 %v1018_v2  ;;  %400 = vperm.xlu0 %858, %v296_v4   ;;  %v1021_v7 = vmov 6   ;;  %v1022_v8 = vmov 1   ;;  %v1023_v9 = vmov 2   ;;  %s1024_s22 = smov 112   ;;  %v1025_v20 = vmov 0   ;;  %s1026_s23 = smov 96  }
  0x24   : > { %419 = vperm.xlu1 %860, %v296_v4   ;;  %316 = vperm.xlu2 %862, %v296_v4   ;;  %v297_v28 = vld [vmem:[#allocation6] sm:$0x77]  ;;  %s1027_s27 = smov 113   ;;  %s1028_s11 = smov 111   ;;  %vm331_vm0 = vcmask 916480   ;;  %vm356_vm1 = vcmask 785408  }
  0x25   : > { %v518_v29 = vperm.slane %v297_v28, 2  ;;  %v519_v30 = vperm.slane %v297_v28, 6  ;;  %v366_v33 = vperm.slane %v297_v28, 0  ;;  %v367_v34 = vperm.slane %v297_v28, 4  ;;  %s1029_s12 = smov 127   ;;  %s1030_s13 = smov 126  }
  0x26   : > { %vm530_vm2 = vcmask 924672   ;;  %vm451_vm3 = vcmask 1039360   ;;  %vm547_vm4 = vcmask 1031168   ;;  %s1031_s14 = smov 17   ;;  %vm378_vm5 = vcmask 908288   ;;  %p281_p1 = scmp.lt.s32.totalorder %s1004_s18, 1 }
  0x27   : > { %v522_v31 = vperm.slane %v518_v29, 2  ;;  %v523_v32 = vperm.slane %v519_v30, 2  ;;  %v370_v37 = vperm.slane %v366_v33, 0  ;;  %v371_v38 = vperm.slane %v367_v34, 0 }
  0x28   : > { %vm565_vm6 = vcmask 138240   ;;  %vm570_vm7 = vcmask 1043456   ;;  %s1250_s18 = smov (!%p281_p1, %s1004_s18), 1  ;;  %vm576_vm8 = vcmask 3072  }
  0x29   : > { %v1150_v10 = vld.sshfl [vmem:[#allocation1] sm:$0xff pattern:$0x75316420]  ;;  %v1152_v11 = vld.sshfl [vmem:[#allocation1 + $0x8] sm:$0xff pattern:$0x75316420] }
  0x2a   : > { %s761_s15 = sshll.u32 %s1250_s18, 2 }
  0x2b   : > { %859 = vset.pattern.permute.xlu0 %v1019_v5  ;;  %s287_s26 = scalar_lea.vmem %s1236_s3, %s761_s15  ;;  %s294_s30 = scalar_lea.vmem %s1237_s4, %s761_s15 }
  0x2c   : > { %861 = vset.pattern.permute.xlu1 %v1020_v6  ;;  %471 = vperm.xlu0 %859, %v296_v4  }
  0x2d   : > { %495 = vperm.xlu1 %861, %v296_v4   ;;  %863 = vset.pattern.permute.xlu2 %v1021_v7 }
  0x2e   : > { %341 = vperm.xlu2 %863, %v296_v4  }
  0x34   : > { %867 = vset.pattern.permute.xlu0 %v1020_v6 }
  0x35   : > { %864 = vset.pattern.permute.xlu1 %v1022_v8 }
  0x36   : > { %390 = vperm.xlu1 %864, %v296_v4   ;;  %865 = vset.pattern.permute.xlu2 %v1023_v9 }
  0x37   : > { %461 = vperm.xlu2 %865, %v296_v4  }
  0x3e   : > { %866 = vset.pattern.permute.xlu1 %v1025_v20 }
  0x7e   : > { %v317_v35 = vpop.permute.xlu2 %316 }
  0x7f   : > { %v321_v36 = vmul.f32 %v317_v35, %v1152_v11  ;;  %v319_v40 = vmul.f32 0.0, %v317_v35  ;;  %v320_v42 = vmul.f32 %v317_v35, %v1150_v10 }
  0x88   : > { %v342_v39 = vpop.permute.xlu2 %341 }
  0x89   : > { %v346_v41 = vmul.f32 0.0, %v342_v39  ;;  %v344_v43 = vmul.f32 %v342_v39, %v1150_v10  ;;  %v345_v44 = vmul.f32 %v342_v39, %v1152_v11 }
  0x91   : > { %v462_v45 = vpop.permute.xlu2 %461 }
  0x92   : > { %v464_v54 = vmul.f32 0.0, %v462_v45 }
  0x95   : > { %v401_v12 = vpop.permute.xlu0 %400 }
  0x96   : > { %v403_v13 = vmul.f32 %v401_v12, %v1150_v10  ;;  %v404_v14 = vmul.f32 %v401_v12, %v1152_v11  ;;  %v420_v19 = vpop.permute.xlu1 %419 }
  0x97   : > { %v422_v21 = vmul.f32 %v420_v19, %v1150_v10  ;;  %v424_v22 = vmul.f32 0.0, %v420_v19  ;;  %v423_v23 = vmul.f32 %v420_v19, %v1152_v11 }
  0x98   : > { %409 = vrot.lane.b32.xlu1 %v404_v14, %s1024_s22  ;;  %407 = vrot.lane.b32.xlu0 %v403_v13, %s1024_s22  ;;  %v466_v14 = vmul.f32 %v462_v45, %v1152_v11 }
  0x9e   : > { %v472_v15 = vpop.permute.xlu0 %471 }
  0x9f   : > { %v474_v16 = vmul.f32 %v472_v15, %v1150_v10  ;;  %v475_v17 = vmul.f32 %v472_v15, %v1152_v11  ;;  %v476_v18 = vmul.f32 0.0, %v472_v15  ;;  %v496_v24 = vpop.permute.xlu1 %495 }
  0xa0   : > { %v498_v25 = vmul.f32 %v496_v24, %v1150_v10  ;;  %v500_v26 = vmul.f32 0.0, %v496_v24  ;;  %v499_v27 = vmul.f32 %v496_v24, %v1152_v11 }
  0xa1   : > { %484 = vrot.lane.b32.xlu1 %v476_v18, %s1024_s22  ;;  %480 = vrot.lane.b32.xlu2 %v474_v16, %s1024_s22  ;;  %v465_v16 = vmul.f32 %v462_v45, %v1150_v10 }
  0xa2   : > { %482 = vrot.lane.b32.xlu0 %v475_v17, %s1024_s22 }
  0xa8   : > { %v391_v47 = vpop.permute.xlu1 %390 }
  0xa9   : > { %432 = vrot.lane.b32.xlu1 %v424_v22, %s1026_s23  ;;  %428 = vrot.lane.b32.xlu2 %v422_v21, %s1026_s23  ;;  %v393_v49 = vmul.f32 0.0, %v391_v47  ;;  %v394_v62 = vmul.f32 %v391_v47, %v1150_v10  ;;  %v395_v63 = vmul.f32 %v391_v47, %v1152_v11 }
  0xaa   : > { %430 = vrot.lane.b32.xlu0 %v423_v23, %s1026_s23 }
  0xb1   : > { %508 = vrot.lane.b32.xlu1 %v500_v26, %s1026_s23  ;;  %504 = vrot.lane.b32.xlu2 %v498_v25, %s1026_s23 }
  0xb2   : > { %506 = vrot.lane.b32.xlu0 %v499_v27, %s1026_s23 }
  0xb9   : > { %526 = vrot.lane.b32.xlu2 %v522_v31, %s1027_s27  ;;  %306 = vperm.xlu1 %866, %v296_v4  }
  0xba   : > { %528 = vrot.lane.b32.xlu0 %v523_v32, %s1027_s27 }
  0xc1   : > { %329 = vrot.lane.b32.xlu1 %v321_v36, %s1024_s22  ;;  %374 = vrot.lane.b32.xlu2 %v370_v37, %s1028_s11 }
  0xc2   : > { %376 = vrot.lane.b32.xlu0 %v371_v38, %s1028_s11 }
  0xc9   : > { %325 = vrot.lane.b32.xlu2 %v319_v40, %s1024_s22  ;;  %354 = vrot.lane.b32.xlu1 %v346_v41, %s1026_s23 }
  0xca   : > { %327 = vrot.lane.b32.xlu0 %v320_v42, %s1024_s22 }
  0xd1   : > { %350 = vrot.lane.b32.xlu2 %v344_v43, %s1026_s23 }
  0xd2   : > { %352 = vrot.lane.b32.xlu0 %v345_v44, %s1026_s23 }
  0xfb   : > { %v481_v46 = vpop.permute.xlu2 %480 }
  0xfc   : > { %v491_v56 = vadd.f32 %v481_v46, %v464_v54 }
 0x103   : > { %v429_v48 = vpop.permute.xlu2 %428 }
 0x10a   : > { %v410_v50 = vpop.permute.xlu1 %409  ;;  %v408_v51 = vpop.permute.xlu0 %407 }
 0x10b   : > { %v415_v52 = vadd.f32 %v408_v51, %v393_v49  ;;  %v505_v53 = vpop.permute.xlu2 %504  ;;  %v411_v0 = vsel %vm331_vm0, %v408_v51, %v410_v50  ;;  %v417_v2 = vadd.f32 %v410_v50, %v395_v63 }
 0x10c   : > { %v515_v57 = vadd.f32 %v505_v53, %v491_v56  ;;  %v416_v3 = vadd.f32 %v411_v0, %v394_v62 }
 0x10d   : > { %v439_v55 = vadd.f32 %v429_v48, %v415_v52 }
 0x10f   : > { %445 = vrot.lane.b32.xlu1 %v439_v55, %s1029_s12 }
 0x113   : > { %v485_v58 = vpop.permute.xlu1 %484  ;;  %v527_v59 = vpop.permute.xlu2 %526 }
 0x114   : > { %v535_v60 = vmul.f32 %v527_v59, %v515_v57  ;;  %v483_v61 = vpop.permute.xlu0 %482 }
 0x115   : > { %v487_v13 = vsel %vm331_vm0, %v483_v61, %v485_v58  ;;  %v486_v15 = vsel %vm331_vm0, %v481_v46, %v483_v61 }
 0x116   : > { %v493_v18 = vadd.f32 %v487_v13, %v466_v14  ;;  %v492_v20 = vadd.f32 %v486_v15, %v465_v16 }
 0x117   : > { %541 = vrot.lane.b32.xlu1 %v535_v60, %s1030_s13 }
 0x11b   : > { %v433_v1 = vpop.permute.xlu1 %432  ;;  %v375_v27 = vpop.permute.xlu2 %374 }
 0x11c   : > { %v431_v4 = vpop.permute.xlu0 %430 }
 0x11d   : > { %v434_v5 = vsel %vm356_vm1, %v429_v48, %v431_v4  ;;  %v435_v6 = vsel %vm356_vm1, %v431_v4, %v433_v1 }
 0x11e   : > { %v440_v7 = vadd.f32 %v434_v5, %v416_v3  ;;  %v441_v8 = vadd.f32 %v435_v6, %v417_v2 }
 0x120   : > { %447 = vrot.lane.b32.xlu2 %v440_v7, %s1029_s12  ;;  %449 = vrot.lane.b32.xlu0 %v441_v8, %s1029_s12 }
 0x123   : > { %v509_v12 = vpop.permute.xlu1 %508  ;;  %v326_v30 = vpop.permute.xlu2 %325 }
 0x124   : > { %v507_v9 = vpop.permute.xlu0 %506 }
 0x125   : > { %v511_v17 = vsel %vm356_vm1, %v507_v9, %v509_v12  ;;  %v510_v19 = vsel %vm356_vm1, %v505_v53, %v507_v9 }
 0x126   : > { %v517_v21 = vadd.f32 %v511_v17, %v493_v18  ;;  %v516_v22 = vadd.f32 %v510_v19, %v492_v20 }
 0x12b   : > { %v307_v28 = vpop.permute.xlu1 %306  ;;  %v351_v36 = vpop.permute.xlu2 %350 }
 0x12c   : > { %v529_v23 = vpop.permute.xlu0 %528  ;;  %v310_v33 = vmul.f32 %v307_v28, %v1150_v10  ;;  %v309_v41 = vmul.f32 0.0, %v307_v28  ;;  %v311_v53 = vmul.f32 %v307_v28, %v1152_v11 }
 0x12d   : > { %v531_v24 = vsel %vm530_vm2, %v527_v59, %v529_v23  ;;  %v537_v25 = vmul.f32 %v529_v23, %v517_v21 }
 0x12e   : > { %v536_v26 = vmul.f32 %v531_v24, %v516_v22 }
 0x12f   : > { %545 = vrot.lane.b32.xlu0 %v537_v25, %s1030_s13 }
 0x130   : > { %543 = vrot.lane.b32.xlu2 %v536_v26, %s1030_s13 }
 0x133   : > { %v330_v32 = vpop.permute.xlu1 %329 }
 0x134   : > { %v377_v29 = vpop.permute.xlu0 %376  ;;  %v339_v55 = vadd.f32 %v330_v32, %v311_v53 }
 0x135   : > { %v379_v59 = vsel %vm378_vm5, %v375_v27, %v377_v29 }
 0x13b   : > { %v355_v40 = vpop.permute.xlu1 %354 }
 0x13c   : > { %v328_v31 = vpop.permute.xlu0 %327 }
 0x13d   : > { %v333_v34 = vsel %vm331_vm0, %v328_v31, %v330_v32  ;;  %v332_v42 = vsel %vm331_vm0, %v326_v30, %v328_v31 }
 0x13e   : > { %v338_v35 = vadd.f32 %v333_v34, %v310_v33  ;;  %v337_v43 = vadd.f32 %v332_v42, %v309_v41 }
 0x140   : > { %v362_v46 = vadd.f32 %v351_v36, %v337_v43 }
 0x142   : > { %v383_v10 = vmul.f32 %v375_v27, %v362_v46 }
 0x144   : > { %v353_v37 = vpop.permute.xlu0 %352 }
 0x145   : > { %v357_v38 = vsel %vm356_vm1, %v351_v36, %v353_v37  ;;  %v358_v56 = vsel %vm356_vm1, %v353_v37, %v355_v40 }
 0x146   : > { %v363_v39 = vadd.f32 %v357_v38, %v338_v35  ;;  %v364_v58 = vadd.f32 %v358_v56, %v339_v55 }
 0x148   : > { %v385_v60 = vmul.f32 %v377_v29, %v364_v58  ;;  %v384_v62 = vmul.f32 %v379_v59, %v363_v39 }
 0x17a   : > { %v448_v45 = vpop.permute.xlu2 %447 }
 0x181   : > { %v446_v44 = vpop.permute.xlu1 %445 }
 0x182   : > { %v452_v47 = vsel %vm451_vm3, %v446_v44, %v448_v45 }
 0x183   : > { %v457_v49 = vadd.f32 %v452_v47, %v383_v10 }
 0x189   : > { %v542_v48 = vpop.permute.xlu1 %541 }
 0x18a   : > { %v544_v50 = vpop.permute.xlu2 %543 }
 0x18b   : > { %v548_v51 = vsel %vm547_vm4, %v542_v48, %v544_v50 }
 0x18c   : > { %v553_v52 = vadd.f32 %v548_v51, %v457_v49 }
 0x18e   : > { %559 = vrot.lane.b32.xlu1 %v553_v52, %s1031_s14  ;;  %v578_v54 = vmul.f32 %v553_v52, %v553_v52 }
 0x192   : > { %v450_v57 = vpop.permute.xlu0 %449 }
 0x193   : > { %v453_v61 = vsel %vm451_vm3, %v448_v45, %v450_v57  ;;  %v459_v63 = vadd.f32 %v450_v57, %v385_v60 }
 0x194   : > { %v458_v0 = vadd.f32 %v453_v61, %v384_v62 }
 0x196   : > { %584 = vrot.lane.b32.xlu1 %v578_v54, %s1031_s14 }
 0x1a1   : > { %v546_v1 = vpop.permute.xlu0 %545 }
 0x1a2   : > { %v549_v2 = vsel %vm547_vm4, %v544_v50, %v546_v1  ;;  %v555_v3 = vadd.f32 %v546_v1, %v459_v63 }
 0x1a3   : > { %v554_v11 = vadd.f32 %v549_v2, %v458_v0 }
 0x1a4   : > { %563 = vrot.lane.b32.xlu0 %v555_v3, %s1031_s14  ;;  %v580_v4 = vmul.f32 %v555_v3, %v555_v3 }
 0x1a5   : > { %561 = vrot.lane.b32.xlu2 %v554_v11, %s1031_s14  ;;  %v579_v5 = vmul.f32 %v554_v11, %v554_v11 }
 0x1ac   : > { %588 = vrot.lane.b32.xlu0 %v580_v4, %s1031_s14 }
 0x1ad   : > { %586 = vrot.lane.b32.xlu2 %v579_v5, %s1031_s14 }
 0x1ff   : > { %v562_v6 = vpop.permute.xlu2 %561 }
 0x200   : > { %v560_v7 = vpop.permute.xlu1 %559 }
 0x201   : > { %v566_v8 = vsel %vm565_vm6, %v560_v7, %v562_v6 }
 0x202   : > { %v571_v13 = vsel %vm570_vm7, %v566_v8, 0.0 }
 0x207   : > { %v587_v16 = vpop.permute.xlu2 %586 }
 0x208   : > { %v585_v17 = vpop.permute.xlu1 %584 }
 0x209   : > { %v590_v18 = vsel %vm565_vm6, %v585_v17, %v587_v16 }
 0x20a   : > { %v594_v21 = vsel %vm570_vm7, %v590_v18, 0.0 }
 0x216   : > { %v564_v9 = vpop.permute.xlu0 %563 }
 0x217   : > { %v567_v12 = vsel %vm565_vm6, %v562_v6, %v564_v9 }
 0x218   : > { %v572_v14 = vsel %vm570_vm7, %v567_v12, 0.0 }
 0x219   : > { %v573_v15 = vadd.f32 %v572_v14, %v571_v13 }
 0x21b   : > { %574 = vadd.xlane.f32.xlu1 %v573_v15 }
 0x21e   : > { %v589_v19 = vpop.permute.xlu0 %588 }
 0x21f   : > { %v591_v20 = vsel %vm565_vm6, %v587_v16, %v589_v19 }
 0x220   : > { %v595_v22 = vsel %vm570_vm7, %v591_v20, 0.0 }
 0x221   : > { %v596_v23 = vadd.f32 %v595_v22, %v594_v21 }
 0x223   : > { %597 = vadd.xlane.f32.xlu2 %v596_v23 }
 0x28e   : > { %v575_v24 = vpop.xlane.xlu1 %574 }
 0x28f   : > { %577 = vst.msk [vmem:[%s287_s26] sm:$0xf] %vm576_vm8, %v575_v24 }
 0x296   : > { %v598_v25 = vpop.xlane.xlu2 %597 }
 0x297   : > { %599 = vst.msk [vmem:[%s294_s30] sm:$0xf] %vm576_vm8, %v598_v25 }
 0x298 PF: > { %s19_s20 = sadd.s32 1, %s1012_s20   ;;  %s1242_s15 = smov %s996_s16 }
 0x299   : > { %p16_p2 = scmp.ge.s32.totalorder %s19_s20, 4   ;;  %s1243_s16 = smov %s1000_s17 }
 0x29a   : > { %s1244_s17 = smov %s1130_s21  ;;  %s1245_s18 = smov %s1008_s19 }
 0x29b   : > { %s1246_s19 = smov %s1248_s9  ;;  %18 = sbr.rel (!%p16_p2) target bundleno = 5 (0x5), region = 93 }
 0x2a0   :  { %645 = vsyncpa [#allocation3], 1 }
 0x2a1   :  { %647 = vsyncpa [#allocation3 + $0x1], 1 }
 0x2a2   :  { %648 = vsyncpa [#allocation5], 1 }

</bundles_post_ra>
